<compile_context>
chip_gen: v7x
topology: tpu7x:2x2x1
jax: 0.10.0
libtpu: 0.0.40
codegen_flags: <defaults>
</compile_context>

<pallas_src>
import functools
import math

import jax
import jax.numpy as jnp
from jax import lax
from jax.experimental import pallas as pl
from jax.experimental.pallas import tpu as pltpu

LN_EPS = 1e-5


def _pick_tile(n, target):
    """Largest divisor of n that is <= target."""
    t = max(1, min(target, n))
    while n % t:
        t -= 1
    return t


# ---------------------------------------------------------------------------
# Kernel 1: pair bias, emitted directly in [B, H, R, R] layout (lane-dense:
# last dim = R, no wrapper transpose).  grid = (B, R // TI).
#   bias[b, h, i, j] = LN(Z)[b, i, j, :] . W_b[h, :]
# ---------------------------------------------------------------------------
def _pair_bias_kernel(z_ref, gz_ref, bz_ref, wb_ref, out_ref):
    TI = z_ref.shape[1]
    z = z_ref[0].astype(jnp.float32)                          # [TI, R, d_pair]
    mu = jnp.mean(z, axis=-1, keepdims=True)
    var = jnp.mean((z - mu) ** 2, axis=-1, keepdims=True)
    z_ln = (z - mu) * lax.rsqrt(var + LN_EPS) * gz_ref[...] + bz_ref[...]
    wb = wb_ref[...]                                          # [H, d_pair]
    for i in range(TI):                                       # static unroll
        # [H, d_pair] @ [d_pair, R] -> [H, R]   (lane-dense output slab)
        out_ref[0, :, i, :] = jnp.dot(
            wb, z_ln[i].T, preferred_element_type=jnp.float32
        ).astype(out_ref.dtype)


# ---------------------------------------------------------------------------
# Kernel 2: TS MSA rows of gated multi-head attention with pair bias.
# grid = (B, S // TS).  Projections are fused across heads (2-D weights).
# ---------------------------------------------------------------------------
def _msa_row_attn_kernel(n_head, c_hidden,
                         m_raw_ref, mask_ref, bias_ref,
                         gm_ref, bm_ref,
                         wqkvg_ref, gb_ref, wo_ref, ob_ref,
                         out_ref):
    TS, R, d_node = m_raw_ref.shape[1], m_raw_ref.shape[2], m_raw_ref.shape[3]
    H, c = n_head, c_hidden
    Hc = H * c

    m_raw = m_raw_ref[0].astype(jnp.float32)                  # [TS, R, d_node]
    mu = jnp.mean(m_raw, axis=-1, keepdims=True)
    var = jnp.mean((m_raw - mu) ** 2, axis=-1, keepdims=True)
    m_ln = (m_raw - mu) * lax.rsqrt(var + LN_EPS) * gm_ref[...] + bm_ref[...]

    mask = mask_ref[0].astype(jnp.float32)                    # [TS, 1, R]
    mask_bias = 1e9 * (mask - 1.0)                            # bias over key axis

    # Fused Q/K/V/gate projections: one [TS*R, d_node] @ [d_node, 4*H*c] matmul.
    # (1/sqrt(c) scaling is pre-folded into the Q columns of wqkvg.)
    qkvg = jnp.dot(m_ln.reshape(TS * R, d_node), wqkvg_ref[...],
                   preferred_element_type=jnp.float32).reshape(TS, R, 4 * Hc)
    q_all = qkvg[:, :, 0 * Hc:1 * Hc]
    k_all = qkvg[:, :, 1 * Hc:2 * Hc]
    v_all = qkvg[:, :, 2 * Hc:3 * Hc]
    gate = jax.nn.sigmoid(qkvg[:, :, 3 * Hc:4 * Hc] + gb_ref[...])   # [TS, R, Hc]

    wa_heads = []
    for h in range(H):                                        # static unroll over heads
        sl = slice(h * c, (h + 1) * c)
        q_h, k_h, v_h = q_all[:, :, sl], k_all[:, :, sl], v_all[:, :, sl]
        logits = jnp.einsum('tqc,tkc->tqk', q_h, k_h,
                            preferred_element_type=jnp.float32)      # [TS, R, R]
        logits = logits + bias_ref[0, h][None] + mask_bias
        # numerically-stable softmax over the key axis
        lmax = jnp.max(logits, axis=-1, keepdims=True)
        e = jnp.exp(logits - lmax)
        p = e * pl.reciprocal(jnp.sum(e, axis=-1, keepdims=True), approx=True)
        wa_heads.append(jnp.einsum('tqk,tkc->tqc', p, v_h,
                                   preferred_element_type=jnp.float32))
    wa_all = jnp.concatenate(wa_heads, axis=-1) * gate               # [TS, R, Hc]

    attn = jnp.dot(wa_all.reshape(TS * R, Hc), wo_ref[...],
                   preferred_element_type=jnp.float32).reshape(TS, R, d_node)
    out_ref[0] = (m_raw + attn + ob_ref[...]).astype(out_ref.dtype)


# ---------------------------------------------------------------------------
# One-time parameter repack into MXU/lane-friendly 2-D layouts.
# ---------------------------------------------------------------------------
def prepare_params(params, *, c, n_head):
    H = n_head
    d_node = params["wq"].shape[1]
    Hc = H * c
    scaling = 1.0 / math.sqrt(c)

    def to_2d(w):                                   # [H, d_node, c] -> [d_node, H*c]
        return jnp.transpose(w, (1, 0, 2)).reshape(d_node, Hc)

    wqkvg = jnp.concatenate(
        [to_2d(params["wq"]) * scaling,             # fold 1/sqrt(c) into W_q
         to_2d(params["wk"]),
         to_2d(params["wv"]),
         to_2d(params["wg"])], axis=-1)             # [d_node, 4*H*c]

    return {
        "gm": params["gm"], "bm": params["bm"],
        "gz": params["gz"], "bz": params["bz"],
        "wb": params["wb_t"].T,                     # [H, d_pair]
        "wqkvg": wqkvg,
        "gb": params["gb"].reshape(1, Hc),          # [H,1,c] -> [1, H*c]
        "wo": params["wo"].reshape(Hc, d_node),     # [H,c,d] -> [H*c, d]
        "ob": params["ob"],
    }


# ---------------------------------------------------------------------------
# Wrapper
# ---------------------------------------------------------------------------
def msa_row_attention_with_pair_bias(M_raw, Z, M_mask, prepped, *, c, n_head,
                                     pair_row_tile=8, msa_row_tile=4):
    B, S, R, d_node = M_raw.shape
    d_pair = Z.shape[-1]
    H = n_head
    Hc = H * c
    TI = _pick_tile(R, pair_row_tile)
    TS = _pick_tile(S, msa_row_tile)
    vmem_cap = 64 * 1024 * 1024

    # ---- pair bias kernel: [B, H, R, R] directly (no wrapper transpose) ----
    bias = pl.pallas_call(
        _pair_bias_kernel,
        out_shape=jax.ShapeDtypeStruct((B, H, R, R), jnp.float32),
        grid_spec=pltpu.PrefetchScalarGridSpec(
            num_scalar_prefetch=0,
            grid=(B, R // TI),
            in_specs=[
                pl.BlockSpec((1, TI, R, d_pair), lambda bi, i: (bi, i, 0, 0)),
                pl.BlockSpec((1, d_pair), lambda bi, i: (0, 0)),
                pl.BlockSpec((1, d_pair), lambda bi, i: (0, 0)),
                pl.BlockSpec((H, d_pair), lambda bi, i: (0, 0)),
            ],
            out_specs=pl.BlockSpec((1, H, TI, R), lambda bi, i: (bi, 0, i, 0)),
        ),
        compiler_params=pltpu.CompilerParams(
            dimension_semantics=("parallel", "parallel"),
            vmem_limit_bytes=vmem_cap),
    )(Z, prepped["gz"], prepped["bz"], prepped["wb"])

    mask4 = M_mask.reshape(B, S, 1, R)                        # (glue, tiny)

    # TODO(synk): for large R (>~500), add a third "arbitrary" (innermost)
    # head/query grid axis with a VMEM f32 accumulator + pl.when init/finalize
    # so the (1,H,R,R) bias block is streamed instead of held resident
    # (v7x 64 MiB / v5e 16 MiB scoped VMEM budgets).
    kernel = functools.partial(_msa_row_attn_kernel, H, c)
    out = pl.pallas_call(
        kernel,
        out_shape=jax.ShapeDtypeStruct((B, S, R, d_node), M_raw.dtype),
        grid_spec=pltpu.PrefetchScalarGridSpec(
            num_scalar_prefetch=0,
            grid=(B, S // TS),
            in_specs=[
                pl.BlockSpec((1, TS, R, d_node), lambda bi, si: (bi, si, 0, 0)),
                pl.BlockSpec((1, TS, 1, R), lambda bi, si: (bi, si, 0, 0)),
                pl.BlockSpec((1, H, R, R), lambda bi, si: (bi, 0, 0, 0)),
                pl.BlockSpec((1, d_node), lambda bi, si: (0, 0)),
                pl.BlockSpec((1, d_node), lambda bi, si: (0, 0)),
                pl.BlockSpec((d_node, 4 * Hc), lambda bi, si: (0, 0)),
                pl.BlockSpec((1, Hc), lambda bi, si: (0, 0)),
                pl.BlockSpec((Hc, d_node), lambda bi, si: (0, 0)),
                pl.BlockSpec((1, d_node), lambda bi, si: (0, 0)),
            ],
            out_specs=pl.BlockSpec((1, TS, R, d_node),
                                   lambda bi, si: (bi, si, 0, 0)),
        ),
        compiler_params=pltpu.CompilerParams(
            dimension_semantics=("parallel", "parallel"),
            vmem_limit_bytes=vmem_cap),
    )(M_raw, mask4, bias,
      prepped["gm"], prepped["bm"],
      prepped["wqkvg"], prepped["gb"], prepped["wo"], prepped["ob"])
    return out


# ---------------------------------------------------------------------------
# Pure-JAX reference (mirrors the PyTorch forward, training=False)
# ---------------------------------------------------------------------------
def reference(M_raw, Z, M_mask, params, *, c, n_head):
    def ln(x, g, b):
        mu = x.mean(-1, keepdims=True)
        var = ((x - mu) ** 2).mean(-1, keepdims=True)
        return (x - mu) / jnp.sqrt(var + LN_EPS) * g + b

    m = ln(M_raw, params["gm"][0], params["bm"][0])
    z = ln(Z, params["gz"][0], params["bz"][0])
    bias = jnp.einsum("bijd,dh->bhij", z, params["wb_t"])          # [B,H,R,R]

    q = jnp.einsum("bsrd,hdc->bsrhc", m, params["wq"]) * (c ** -0.5)
    k = jnp.einsum("bsrd,hdc->bsrhc", m, params["wk"])
    v = jnp.einsum("bsrd,hdc->bsrhc", m, params["wv"])
    logits = jnp.einsum("bsihc,bsjhc->bshij", q, k)
    logits = logits + bias[:, None]
    logits = logits + (1e9 * (M_mask - 1.0))[:, :, None, None, :]
    w = jax.nn.softmax(logits, axis=-1)
    wa = jnp.einsum("bshij,bsjhc->bsihc", w, v)
    gate = jax.nn.sigmoid(jnp.einsum("bsrd,hdc->bsrhc", m, params["wg"])
                          + params["gb"][:, 0][None, None, None])
    wa = wa * gate
    attn = jnp.einsum("bsrhc,hcd->bsrd", wa, params["wo"])
    return M_raw + attn + params["ob"][0]


# ---------------------------------------------------------------------------
if __name__ == "__main__":
    B, S, R = 2, 8, 16
    d_node, d_pair = 32, 16
    c, n_head = 8, 4

    key = jax.random.PRNGKey(0)
    ks = jax.random.split(key, 16)

    M_raw = jax.random.normal(ks[0], (B, S, R, d_node), jnp.float32)
    Z = jax.random.normal(ks[1], (B, R, R, d_pair), jnp.float32)
    M_mask = (jax.random.uniform(ks[2], (B, S, R)) > 0.1).astype(jnp.float32)

    # Deterministic synthetic parameters (shapes match the torch module).
    std_b = 1.0 / math.sqrt(d_pair)
    params = {
        "gm": jnp.ones((1, d_node), jnp.float32),                     # LayerNorm M weight
        "bm": jnp.zeros((1, d_node), jnp.float32),                    # LayerNorm M bias
        "gz": jnp.ones((1, d_pair), jnp.float32),                     # LayerNorm Z weight
        "bz": jnp.zeros((1, d_pair), jnp.float32),                    # LayerNorm Z bias
        "wb_t": std_b * jax.random.normal(ks[3], (d_pair, n_head), jnp.float32),
        "wq": 0.1 * jax.random.normal(ks[4], (n_head, d_node, c), jnp.float32),
        "wk": 0.1 * jax.random.normal(ks[5], (n_head, d_node, c), jnp.float32),
        "wv": 0.1 * jax.random.normal(ks[6], (n_head, d_node, c), jnp.float32),
        "wg": 0.1 * jax.random.normal(ks[7], (n_head, d_node, c), jnp.float32),
        "gb": jnp.ones((n_head, 1, c), jnp.float32),                  # gating bias
        "wo": 0.1 * jax.random.normal(ks[8], (n_head, c, d_node), jnp.float32),
        "ob": 0.01 * jax.random.normal(ks[9], (1, d_node), jnp.float32),  # fused out bias
    }

    prepped = prepare_params(params, c=c, n_head=n_head)

    out = msa_row_attention_with_pair_bias(M_raw, Z, M_mask, prepped,
                                           c=c, n_head=n_head)
    out = jax.block_until_ready(out)

    ref = reference(M_raw, Z, M_mask, params, c=c, n_head=n_head)
    assert out.shape == (B, S, R, d_node)
    assert jnp.allclose(out, ref, atol=1e-2, rtol=1e-2), \
        f"max abs diff {jnp.max(jnp.abs(out - ref))}"

    print("KERNEL_OK")
</pallas_src>

<mosaic_0001>
module attributes {stable_mosaic.version = 11 : i64} {
  func.func @_pair_bias_kernel(%arg0: i32, %arg1: i32, %arg2: memref<1x8x16x16xf32, #tpu.memory_space<vmem>>, %arg3: memref<1x16xf32, #tpu.memory_space<vmem>>, %arg4: memref<1x16xf32, #tpu.memory_space<vmem>>, %arg5: memref<4x16xf32, #tpu.memory_space<vmem>>, %arg6: memref<1x4x8x16xf32, #tpu.memory_space<vmem>>) attributes {dimension_semantics = [#tpu.dimension_semantics<parallel>, #tpu.dimension_semantics<parallel>], iteration_bounds = array<i64: 2, 2>, scalar_prefetch = 0 : i64, scratch_operands = 0 : i64, tpu.core_type = #tpu.core_type<tc>, window_params = [{transform_indices = @transform_0, window_bounds = array<i64: 1, 8, 16, 16>}, {pipeline_mode = #tpu.pipeline_mode<synchronous>, transform_indices = @transform_1, window_bounds = array<i64: 1, 16>}, {pipeline_mode = #tpu.pipeline_mode<synchronous>, transform_indices = @transform_2, window_bounds = array<i64: 1, 16>}, {pipeline_mode = #tpu.pipeline_mode<synchronous>, transform_indices = @transform_3, window_bounds = array<i64: 4, 16>}, {transform_indices = @transform_4, window_bounds = array<i64: 1, 4, 8, 16>}]} {
    %c0 = arith.constant 0 : index
    %c0_0 = arith.constant 0 : index
    %c0_1 = arith.constant 0 : index
    %c0_2 = arith.constant 0 : index
    %0 = vector.load %arg2[%c0, %c0_0, %c0_1, %c0_2] : memref<1x8x16x16xf32, #tpu.memory_space<vmem>>, vector<1x8x16x16xf32>
    %1 = vector.shape_cast %0 : vector<1x8x16x16xf32> to vector<8x16x16xf32>
    %cst = arith.constant dense<0.000000e+00> : vector<8x16xf32>
    %2 = vector.multi_reduction <add>, %1, %cst [2] : vector<8x16x16xf32> to vector<8x16xf32>
    %3 = vector.shape_cast %2 : vector<8x16xf32> to vector<8x16x1xf32>
    %cst_3 = arith.constant 1.600000e+01 : f32
    %4 = vector.broadcast %cst_3 : f32 to vector<8x16x1xf32>
    %5 = arith.divf %3, %4 : vector<8x16x1xf32>
    %6 = vector.broadcast %5 : vector<8x16x1xf32> to vector<8x16x16xf32>
    %7 = arith.subf %1, %6 : vector<8x16x16xf32>
    %8 = arith.mulf %7, %7 : vector<8x16x16xf32>
    %cst_4 = arith.constant dense<0.000000e+00> : vector<8x16xf32>
    %9 = vector.multi_reduction <add>, %8, %cst_4 [2] : vector<8x16x16xf32> to vector<8x16xf32>
    %10 = vector.shape_cast %9 : vector<8x16xf32> to vector<8x16x1xf32>
    %cst_5 = arith.constant 1.600000e+01 : f32
    %11 = vector.broadcast %cst_5 : f32 to vector<8x16x1xf32>
    %12 = arith.divf %10, %11 : vector<8x16x1xf32>
    %13 = vector.broadcast %5 : vector<8x16x1xf32> to vector<8x16x16xf32>
    %14 = arith.subf %1, %13 : vector<8x16x16xf32>
    %cst_6 = arith.constant 9.99999974E-6 : f32
    %15 = vector.broadcast %cst_6 : f32 to vector<8x16x1xf32>
    %16 = arith.addf %12, %15 : vector<8x16x1xf32>
    %17 = math.rsqrt %16 : vector<8x16x1xf32>
    %18 = vector.broadcast %17 : vector<8x16x1xf32> to vector<8x16x16xf32>
    %19 = arith.mulf %14, %18 : vector<8x16x16xf32>
    %c0_7 = arith.constant 0 : index
    %c0_8 = arith.constant 0 : index
    %20 = vector.load %arg3[%c0_7, %c0_8] : memref<1x16xf32, #tpu.memory_space<vmem>>, vector<1x16xf32>
    %21 = vector.shape_cast %20 : vector<1x16xf32> to vector<1x1x16xf32>
    %22 = vector.broadcast %21 : vector<1x1x16xf32> to vector<8x16x16xf32>
    %23 = arith.mulf %19, %22 : vector<8x16x16xf32>
    %c0_9 = arith.constant 0 : index
    %c0_10 = arith.constant 0 : index
    %24 = vector.load %arg4[%c0_9, %c0_10] : memref<1x16xf32, #tpu.memory_space<vmem>>, vector<1x16xf32>
    %25 = vector.shape_cast %24 : vector<1x16xf32> to vector<1x1x16xf32>
    %26 = vector.broadcast %25 : vector<1x1x16xf32> to vector<8x16x16xf32>
    %27 = arith.addf %23, %26 : vector<8x16x16xf32>
    %c0_11 = arith.constant 0 : index
    %c0_12 = arith.constant 0 : index
    %28 = vector.load %arg5[%c0_11, %c0_12] : memref<4x16xf32, #tpu.memory_space<vmem>>, vector<4x16xf32>
    %29 = vector.extract_strided_slice %27 {offsets = [0, 0, 0], sizes = [1, 16, 16], strides = [1, 1, 1]} : vector<8x16x16xf32> to vector<1x16x16xf32>
    %30 = vector.shape_cast %29 : vector<1x16x16xf32> to vector<16x16xf32>
    %31 = tpu.transpose %30, [1, 0] : vector<16x16xf32> -> vector<16x16xf32>
    %cst_13 = arith.constant dense<0.000000e+00> : vector<4x16xf32>
    %32 = tpu.matmul %28, %31, %cst_13 {dimension_numbers = #tpu.dot_dimension_numbers<[1], [0], [0], [1], [0, 0, 1, 1], [], []>} : vector<4x16xf32>, vector<16x16xf32>, vector<4x16xf32> -> vector<4x16xf32>
    %c0_14 = arith.constant 0 : index
    %c0_15 = arith.constant 0 : index
    %c0_16 = arith.constant 0 : index
    %c0_17 = arith.constant 0 : index
    %33 = vector.load %arg6[%c0_14, %c0_15, %c0_16, %c0_17] : memref<1x4x8x16xf32, #tpu.memory_space<vmem>>, vector<1x4x1x16xf32>
    %34 = vector.shape_cast %33 : vector<1x4x1x16xf32> to vector<4x16xf32>
    %35 = vector.shape_cast %32 : vector<4x16xf32> to vector<1x4x1x16xf32>
    tpu.vector_store %arg6[%c0_14, %c0_15, %c0_16, %c0_17], %35 {strides = array<i32>} : memref<1x4x8x16xf32, #tpu.memory_space<vmem>>, vector<1x4x1x16xf32>,
    %36 = vector.extract_strided_slice %27 {offsets = [1, 0, 0], sizes = [1, 16, 16], strides = [1, 1, 1]} : vector<8x16x16xf32> to vector<1x16x16xf32>
    %37 = vector.shape_cast %36 : vector<1x16x16xf32> to vector<16x16xf32>
    %38 = tpu.transpose %37, [1, 0] : vector<16x16xf32> -> vector<16x16xf32>
    %cst_18 = arith.constant dense<0.000000e+00> : vector<4x16xf32>
    %39 = tpu.matmul %28, %38, %cst_18 {dimension_numbers = #tpu.dot_dimension_numbers<[1], [0], [0], [1], [0, 0, 1, 1], [], []>} : vector<4x16xf32>, vector<16x16xf32>, vector<4x16xf32> -> vector<4x16xf32>
    %c0_19 = arith.constant 0 : index
    %c0_20 = arith.constant 0 : index
    %c1 = arith.constant 1 : index
    %c0_21 = arith.constant 0 : index
    %40 = vector.load %arg6[%c0_19, %c0_20, %c1, %c0_21] : memref<1x4x8x16xf32, #tpu.memory_space<vmem>>, vector<1x4x1x16xf32>
    %41 = vector.shape_cast %40 : vector<1x4x1x16xf32> to vector<4x16xf32>
    %42 = vector.shape_cast %39 : vector<4x16xf32> to vector<1x4x1x16xf32>
    tpu.vector_store %arg6[%c0_19, %c0_20, %c1, %c0_21], %42 {strides = array<i32>} : memref<1x4x8x16xf32, #tpu.memory_space<vmem>>, vector<1x4x1x16xf32>,
    %43 = vector.extract_strided_slice %27 {offsets = [2, 0, 0], sizes = [1, 16, 16], strides = [1, 1, 1]} : vector<8x16x16xf32> to vector<1x16x16xf32>
    %44 = vector.shape_cast %43 : vector<1x16x16xf32> to vector<16x16xf32>
    %45 = tpu.transpose %44, [1, 0] : vector<16x16xf32> -> vector<16x16xf32>
    %cst_22 = arith.constant dense<0.000000e+00> : vector<4x16xf32>
    %46 = tpu.matmul %28, %45, %cst_22 {dimension_numbers = #tpu.dot_dimension_numbers<[1], [0], [0], [1], [0, 0, 1, 1], [], []>} : vector<4x16xf32>, vector<16x16xf32>, vector<4x16xf32> -> vector<4x16xf32>
    %c0_23 = arith.constant 0 : index
    %c0_24 = arith.constant 0 : index
    %c2 = arith.constant 2 : index
    %c0_25 = arith.constant 0 : index
    %47 = vector.load %arg6[%c0_23, %c0_24, %c2, %c0_25] : memref<1x4x8x16xf32, #tpu.memory_space<vmem>>, vector<1x4x1x16xf32>
    %48 = vector.shape_cast %47 : vector<1x4x1x16xf32> to vector<4x16xf32>
    %49 = vector.shape_cast %46 : vector<4x16xf32> to vector<1x4x1x16xf32>
    tpu.vector_store %arg6[%c0_23, %c0_24, %c2, %c0_25], %49 {strides = array<i32>} : memref<1x4x8x16xf32, #tpu.memory_space<vmem>>, vector<1x4x1x16xf32>,
    %50 = vector.extract_strided_slice %27 {offsets = [3, 0, 0], sizes = [1, 16, 16], strides = [1, 1, 1]} : vector<8x16x16xf32> to vector<1x16x16xf32>
    %51 = vector.shape_cast %50 : vector<1x16x16xf32> to vector<16x16xf32>
    %52 = tpu.transpose %51, [1, 0] : vector<16x16xf32> -> vector<16x16xf32>
    %cst_26 = arith.constant dense<0.000000e+00> : vector<4x16xf32>
    %53 = tpu.matmul %28, %52, %cst_26 {dimension_numbers = #tpu.dot_dimension_numbers<[1], [0], [0], [1], [0, 0, 1, 1], [], []>} : vector<4x16xf32>, vector<16x16xf32>, vector<4x16xf32> -> vector<4x16xf32>
    %c0_27 = arith.constant 0 : index
    %c0_28 = arith.constant 0 : index
    %c3 = arith.constant 3 : index
    %c0_29 = arith.constant 0 : index
    %54 = vector.load %arg6[%c0_27, %c0_28, %c3, %c0_29] : memref<1x4x8x16xf32, #tpu.memory_space<vmem>>, vector<1x4x1x16xf32>
    %55 = vector.shape_cast %54 : vector<1x4x1x16xf32> to vector<4x16xf32>
    %56 = vector.shape_cast %53 : vector<4x16xf32> to vector<1x4x1x16xf32>
    tpu.vector_store %arg6[%c0_27, %c0_28, %c3, %c0_29], %56 {strides = array<i32>} : memref<1x4x8x16xf32, #tpu.memory_space<vmem>>, vector<1x4x1x16xf32>,
    %57 = vector.extract_strided_slice %27 {offsets = [4, 0, 0], sizes = [1, 16, 16], strides = [1, 1, 1]} : vector<8x16x16xf32> to vector<1x16x16xf32>
    %58 = vector.shape_cast %57 : vector<1x16x16xf32> to vector<16x16xf32>
    %59 = tpu.transpose %58, [1, 0] : vector<16x16xf32> -> vector<16x16xf32>
    %cst_30 = arith.constant dense<0.000000e+00> : vector<4x16xf32>
    %60 = tpu.matmul %28, %59, %cst_30 {dimension_numbers = #tpu.dot_dimension_numbers<[1], [0], [0], [1], [0, 0, 1, 1], [], []>} : vector<4x16xf32>, vector<16x16xf32>, vector<4x16xf32> -> vector<4x16xf32>
    %c0_31 = arith.constant 0 : index
    %c0_32 = arith.constant 0 : index
    %c4 = arith.constant 4 : index
    %c0_33 = arith.constant 0 : index
    %61 = vector.load %arg6[%c0_31, %c0_32, %c4, %c0_33] : memref<1x4x8x16xf32, #tpu.memory_space<vmem>>, vector<1x4x1x16xf32>
    %62 = vector.shape_cast %61 : vector<1x4x1x16xf32> to vector<4x16xf32>
    %63 = vector.shape_cast %60 : vector<4x16xf32> to vector<1x4x1x16xf32>
    tpu.vector_store %arg6[%c0_31, %c0_32, %c4, %c0_33], %63 {strides = array<i32>} : memref<1x4x8x16xf32, #tpu.memory_space<vmem>>, vector<1x4x1x16xf32>,
    %64 = vector.extract_strided_slice %27 {offsets = [5, 0, 0], sizes = [1, 16, 16], strides = [1, 1, 1]} : vector<8x16x16xf32> to vector<1x16x16xf32>
    %65 = vector.shape_cast %64 : vector<1x16x16xf32> to vector<16x16xf32>
    %66 = tpu.transpose %65, [1, 0] : vector<16x16xf32> -> vector<16x16xf32>
    %cst_34 = arith.constant dense<0.000000e+00> : vector<4x16xf32>
    %67 = tpu.matmul %28, %66, %cst_34 {dimension_numbers = #tpu.dot_dimension_numbers<[1], [0], [0], [1], [0, 0, 1, 1], [], []>} : vector<4x16xf32>, vector<16x16xf32>, vector<4x16xf32> -> vector<4x16xf32>
    %c0_35 = arith.constant 0 : index
    %c0_36 = arith.constant 0 : index
    %c5 = arith.constant 5 : index
    %c0_37 = arith.constant 0 : index
    %68 = vector.load %arg6[%c0_35, %c0_36, %c5, %c0_37] : memref<1x4x8x16xf32, #tpu.memory_space<vmem>>, vector<1x4x1x16xf32>
    %69 = vector.shape_cast %68 : vector<1x4x1x16xf32> to vector<4x16xf32>
    %70 = vector.shape_cast %67 : vector<4x16xf32> to vector<1x4x1x16xf32>
    tpu.vector_store %arg6[%c0_35, %c0_36, %c5, %c0_37], %70 {strides = array<i32>} : memref<1x4x8x16xf32, #tpu.memory_space<vmem>>, vector<1x4x1x16xf32>,
    %71 = vector.extract_strided_slice %27 {offsets = [6, 0, 0], sizes = [1, 16, 16], strides = [1, 1, 1]} : vector<8x16x16xf32> to vector<1x16x16xf32>
    %72 = vector.shape_cast %71 : vector<1x16x16xf32> to vector<16x16xf32>
    %73 = tpu.transpose %72, [1, 0] : vector<16x16xf32> -> vector<16x16xf32>
    %cst_38 = arith.constant dense<0.000000e+00> : vector<4x16xf32>
    %74 = tpu.matmul %28, %73, %cst_38 {dimension_numbers = #tpu.dot_dimension_numbers<[1], [0], [0], [1], [0, 0, 1, 1], [], []>} : vector<4x16xf32>, vector<16x16xf32>, vector<4x16xf32> -> vector<4x16xf32>
    %c0_39 = arith.constant 0 : index
    %c0_40 = arith.constant 0 : index
    %c6 = arith.constant 6 : index
    %c0_41 = arith.constant 0 : index
    %75 = vector.load %arg6[%c0_39, %c0_40, %c6, %c0_41] : memref<1x4x8x16xf32, #tpu.memory_space<vmem>>, vector<1x4x1x16xf32>
    %76 = vector.shape_cast %75 : vector<1x4x1x16xf32> to vector<4x16xf32>
    %77 = vector.shape_cast %74 : vector<4x16xf32> to vector<1x4x1x16xf32>
    tpu.vector_store %arg6[%c0_39, %c0_40, %c6, %c0_41], %77 {strides = array<i32>} : memref<1x4x8x16xf32, #tpu.memory_space<vmem>>, vector<1x4x1x16xf32>,
    %78 = vector.extract_strided_slice %27 {offsets = [7, 0, 0], sizes = [1, 16, 16], strides = [1, 1, 1]} : vector<8x16x16xf32> to vector<1x16x16xf32>
    %79 = vector.shape_cast %78 : vector<1x16x16xf32> to vector<16x16xf32>
    %80 = tpu.transpose %79, [1, 0] : vector<16x16xf32> -> vector<16x16xf32>
    %cst_42 = arith.constant dense<0.000000e+00> : vector<4x16xf32>
    %81 = tpu.matmul %28, %80, %cst_42 {dimension_numbers = #tpu.dot_dimension_numbers<[1], [0], [0], [1], [0, 0, 1, 1], [], []>} : vector<4x16xf32>, vector<16x16xf32>, vector<4x16xf32> -> vector<4x16xf32>
    %c0_43 = arith.constant 0 : index
    %c0_44 = arith.constant 0 : index
    %c7 = arith.constant 7 : index
    %c0_45 = arith.constant 0 : index
    %82 = vector.load %arg6[%c0_43, %c0_44, %c7, %c0_45] : memref<1x4x8x16xf32, #tpu.memory_space<vmem>>, vector<1x4x1x16xf32>
    %83 = vector.shape_cast %82 : vector<1x4x1x16xf32> to vector<4x16xf32>
    %84 = vector.shape_cast %81 : vector<4x16xf32> to vector<1x4x1x16xf32>
    tpu.vector_store %arg6[%c0_43, %c0_44, %c7, %c0_45], %84 {strides = array<i32>} : memref<1x4x8x16xf32, #tpu.memory_space<vmem>>, vector<1x4x1x16xf32>,
    return
  }
  func.func @transform_0(%arg0: i32, %arg1: i32) -> (i32, i32, i32, i32) {
    %c0_i32 = arith.constant 0 : i32
    %c0_i32_0 = arith.constant 0 : i32
    %c0_i32_1 = arith.constant 0 : i32
    return %arg0, %arg1, %c0_i32, %c0_i32_0 : i32, i32, i32, i32
  }
  func.func @transform_1(%arg0: i32, %arg1: i32) -> (i32, i32) {
    %c0_i32 = arith.constant 0 : i32
    %c0_i32_0 = arith.constant 0 : i32
    %c0_i32_1 = arith.constant 0 : i32
    return %c0_i32, %c0_i32_0 : i32, i32
  }
  func.func @transform_2(%arg0: i32, %arg1: i32) -> (i32, i32) {
    %c0_i32 = arith.constant 0 : i32
    %c0_i32_0 = arith.constant 0 : i32
    %c0_i32_1 = arith.constant 0 : i32
    return %c0_i32, %c0_i32_0 : i32, i32
  }
  func.func @transform_3(%arg0: i32, %arg1: i32) -> (i32, i32) {
    %c0_i32 = arith.constant 0 : i32
    %c0_i32_0 = arith.constant 0 : i32
    %c0_i32_1 = arith.constant 0 : i32
    return %c0_i32, %c0_i32_0 : i32, i32
  }
  func.func @transform_4(%arg0: i32, %arg1: i32) -> (i32, i32, i32, i32) {
    %c0_i32 = arith.constant 0 : i32
    %c0_i32_0 = arith.constant 0 : i32
    %c0_i32_1 = arith.constant 0 : i32
    return %arg0, %c0_i32, %arg1, %c0_i32_0 : i32, i32, i32, i32
  }
}

</mosaic_0001>

<bundles_post_ra>
// kernel: tpu_custom_call.1
= control target key start
LH: loop header
LB: loop body
LE: loop exit
PB: predicated region body
PF: predicated region fallthrough
CT: control target
= control target key end

     0   :  { %s2799_s0 = inlined_call_operand.hbm [shape: f32[2,16,16,16], index: 0, kind: input, shape index: {}]   ;;  %s2800_s1 = inlined_call_operand.hbm [shape: f32[1,16], index: 1, kind: input, shape index: {}]   ;;  %s2801_s2 = inlined_call_operand.hbm [shape: f32[1,16], index: 2, kind: input, shape index: {}]   ;;  %s2802_s3 = inlined_call_operand.hbm [shape: f32[4,16], index: 3, kind: input, shape index: {}]   ;;  %s2803_s4 = inlined_call_operand.hbm [shape: f32[2,4,16,16], index: 4, kind: output, shape index: {}]  }
   0x1   :  { %2811 = sst [smem:[#allocation18_spill]] %s2800_s1 }
   0x2   :  { %2812 = sst [smem:[#allocation19_spill]] %s2801_s2 }
   0x3   :  { %2813 = sst [smem:[#allocation20_spill]] %s2802_s3 }
   0x4   :  { %9 = vsyncpa [#allocation3], 0 }
   0x5   :  { %11 = vsyncpa [#allocation3 + $0x1], 0 }
   0x6   :  { %12 = vsyncpa [#allocation6], 0 }
   0x7   :  { %13 = vsyncpa [#allocation9], 0 }
   0x8   :  { %14 = vsyncpa [#allocation4], 0 }
   0x9   :  { %16 = vsyncpa [#allocation4 + $0x1], 0  ;;  %s2129_s15 = smov 0   ;;  %s2131_s16 = smov 0  }
   0xa   :  { %s2133_s17 = smov 0   ;;  %s2135_s18 = smov 0  }
   0xb   :  { %s2137_s19 = smov 0   ;;  %s2139_s20 = smov 0  }
   0xc   :  { %s2141_s21 = smov 0   ;;  %s2143_s22 = smov 0  }
   0xd LB: > { %s1556_s23 = sadd.s32 4294967295, %s2088_s22   ;;  %s1557_s24 = sadd.s32 4294967294, %s2088_s22   ;;  %s2088_s22 = sphi %s2143_s22, %s22_s22   ;;  %s2084_s21 = sphi %s2141_s21, %s2846_s21   ;;  %s2080_s20 = sphi %s2139_s20, %s2845_s20   ;;  %s2076_s19 = sphi %s2137_s19, %s2844_s19   ;;  %s2072_s18 = sphi %s2135_s18, %s2843_s18   ;;  %s2068_s17 = sphi %s2133_s17, %s2842_s17   ;;  %s2064_s16 = sphi %s2131_s16, %s2841_s16   ;;  %s2060_s15 = sphi %s2129_s15, %s2840_s15  }
   0xe   : > { %p56_p0 = scmp.ne.s32.totalorder %s2064_s16, %s2060_s15  ;;  %p2173_p1 = scmp.eq.s32.totalorder %s1556_s23, 0 }
   0xf   : > { %p2177_p2 = scmp.eq.s32.totalorder %s1556_s23, 3  ;;  %p151_p3 = scmp.eq.s32.totalorder %s1557_s24, 3 }
  0x10   : > { %s2814_s25 = scalar_select %p2173_p1, 1, 0 }
  0x11   : > { %s2815_s26 = scalar_select %p2177_p2, 1, 0 }
  0x12   : > { %p2183_p4 = por %p2173_p1, %p56_p0  ;;  %p1558_p5 = scmp.ge.s32.totalorder %s2088_s22, 1 }
  0x13   : > { %p2188_p6 = por %p151_p3, %p56_p0  ;;  %p158_p7 = scmp.lt.s32.totalorder %s2088_s22, 5 }
  0x14   : > { %s2816_s27 = scalar_select %p2183_p4, 1, 0 }
  0x15   : > { %s2817_s28 = scalar_select %p2188_p6, 1, 0 }
  0x16   : > { %p2193_p8 = pnand %p1558_p5, %p158_p7  ;;  %s2090_s30 = smov [#allocation5]  }
  0x17   : > { %2818 = sst [smem:[#allocation15_spill]] %s2817_s28  ;;  %s171_s5 = sshll.u32 %s2090_s30, 4  ;;  %s172_s5 = int_to_ptr.vmem [resolvable:$true] %s171_s5 }
  0x18   : > { %s2819_s29 = scalar_select %p2193_p8, 1, 0 }
  0x19   : > { %p1734_p9 = pneg %p2193_p8  ;;  %s2091_s6 = smov [#allocation7]  }
  0x1a   : > { %s182_s7 = sshll.u32 %s2091_s6, 4  ;;  %s2092_s9 = smov [#allocation8]   ;;  %s2205_s7 = int_to_ptr.vmem [resolvable:$true] %s182_s7 }
  0x1b   : > { %p2201_p10 = pnand %p1734_p9, %p2173_p1  ;;  %s193_s10 = sshll.u32 %s2092_s9, 4  ;;  %s2207_s10 = int_to_ptr.vmem [resolvable:$true] %s193_s10 }
  0x1c   : > { %s2821_s1 = sld [smem:[#allocation18_spill]] }
  0x1d   : > { %p2217_p12 = pneg %p2201_p10 }
  0x22   : > { %s1868_s13 = scalar_lea.hbm %s2821_s1, 16 }
  0x23   : > { %p1869_p11 = scmp.ne.s32.totalorder %s2821_s1, %s1868_s13  ;;  %p1875_p3 = scmp.lt.u32.totalorder %s1868_s13, %s2821_s1 }
  0x25   : > { %p1871_p13 = pnand %p2217_p12, %p1869_p11 }
  0x27   : > { %p1872_p0 = pneg %p1871_p13 }
  0x29   : > { %p1877_p5 = pnand %p1875_p3, %p1872_p0 }
  0x2b   : > { %1880 = shalt.err (!%p1877_p5)
}
  0x2c   : > { %s1881_s9 = scalar_lea.vmem %s172_s5, 16  ;;  %s1888_s11 = scalar_lea.vmem %s172_s5, 32 }
  0x2d   : > { %p1882_p7 = scmp.ne.s32.totalorder %s172_s5, %s1881_s9  ;;  %p1889_p1 = scmp.lt.s32.totalorder %s172_s5, %s172_s5 }
  0x2e   : > { %p1890_p4 = scmp.lt.s32.totalorder %s1888_s11, %s1881_s9 }
  0x2f   : > { %p1884_p9 = pnand %p1882_p7, %p2217_p12 }
  0x30   : > { %p1891_p8 = por %p1890_p4, %p1889_p1 }
  0x31   : > { %p1885_p6 = pneg %p1884_p9 }
  0x33   : > { %p1892_p2 = pnand %p1891_p8, %p1885_p6 }
  0x35   : > { %1895 = shalt.err (!%p1892_p2)
}
  0x36   : > { %1737 = dma.hbm_to_vmem [thread:$0]  (!%p2201_p10), %s2821_s1, 16, %s172_s5, [#allocation6]  }
  0x37   : > { %s2823_s2 = sld [smem:[#allocation19_spill]] }
  0x3d   : > { %s1896_s30 = scalar_lea.hbm %s2823_s2, 16 }
  0x3e   : > { %p1897_p11 = scmp.ne.s32.totalorder %s2823_s2, %s1896_s30  ;;  %p1903_p2 = scmp.lt.u32.totalorder %s1896_s30, %s2823_s2 }
  0x40   : > { %p1899_p13 = pnand %p1897_p11, %p2217_p12 }
  0x42   : > { %p1900_p1 = pneg %p1899_p13 }
  0x44   : > { %p1905_p4 = pnand %p1903_p2, %p1900_p1 }
  0x46   : > { %1908 = shalt.err (!%p1905_p4)
}
  0x47   : > { %s1909_s5 = scalar_lea.vmem %s2205_s7, 16  ;;  %s1916_s28 = scalar_lea.vmem %s2205_s7, 32 }
  0x48   : > { %p1910_p6 = scmp.ne.s32.totalorder %s2205_s7, %s1909_s5  ;;  %p1917_p3 = scmp.lt.s32.totalorder %s2205_s7, %s2205_s7 }
  0x49   : > { %p1918_p5 = scmp.lt.s32.totalorder %s1916_s28, %s1909_s5 }
  0x4a   : > { %p1912_p8 = pnand %p1910_p6, %p2217_p12 }
  0x4b   : > { %p1919_p7 = por %p1918_p5, %p1917_p3 }
  0x4c   : > { %p1913_p0 = pneg %p1912_p8 }
  0x4e   : > { %p1920_p9 = pnand %p1919_p7, %p1913_p0 }
  0x50   : > { %1923 = shalt.err (!%p1920_p9)
}
  0x51   : > { %1740 = dma.hbm_to_vmem [thread:$0]  (!%p2201_p10), %s2823_s2, 16, %s2205_s7, [#allocation6]  }
  0x52   : > { %s2824_s3 = sld [smem:[#allocation20_spill]] }
  0x58   : > { %s1924_s30 = scalar_lea.hbm %s2824_s3, 64 }
  0x59   : > { %p1925_p11 = scmp.ne.s32.totalorder %s2824_s3, %s1924_s30  ;;  %p1931_p2 = scmp.lt.u32.totalorder %s1924_s30, %s2824_s3 }
  0x5b   : > { %p1927_p13 = pnand %p1925_p11, %p2217_p12 }
  0x5d   : > { %p1928_p1 = pneg %p1927_p13 }
  0x5f   : > { %p1933_p4 = pnand %p1931_p2, %p1928_p1 }
  0x61   : > { %1936 = shalt.err (!%p1933_p4)
}
  0x62   : > { %s1937_s7 = scalar_lea.vmem %s2207_s10, 64  ;;  %p1945_p3 = scmp.lt.s32.totalorder %s2207_s10, %s2207_s10 }
  0x63   : > { %p1938_p6 = scmp.ne.s32.totalorder %s2207_s10, %s1937_s7  ;;  %p1946_p5 = scmp.lt.s32.totalorder %s1937_s7, %s1937_s7 }
  0x65   : > { %p1940_p8 = pnand %p1938_p6, %p2217_p12  ;;  %p1947_p7 = por %p1946_p5, %p1945_p3 }
  0x67   : > { %p1941_p0 = pneg %p1940_p8 }
  0x69   : > { %p1948_p9 = pnand %p1947_p7, %p1941_p0 }
  0x6b   : > { %1951 = shalt.err (!%p1948_p9)
}
  0x6c   : > { %1743 = dma.hbm_to_vmem [thread:$0]  (!%p2201_p10), %s2824_s3, 64, %s2207_s10, [#allocation9]  }
  0x6d   : > { %s31_s24 = sadd.s32 1, %s2080_s20  ;;  %s34_s8 = sadd.s32 1, %s2084_s21 }
  0x6e   : > { %p32_p12 = scmp.ge.s32.totalorder %s31_s24, 2  ;;  %s43_s14 = sadd.s32 1, %s2068_s17 }
  0x6f   : > { %p50_p11 = scmp.ne.s32.totalorder %s2068_s17, %s2064_s16  ;;  %p51_p13 = scmp.eq.s32.totalorder %s2088_s22, 0 }
  0x70   : > { %s2848_s24 = smov (%p32_p12, %s31_s24), 0  ;;  %s2850_s8 = smov (!%p32_p12, %s34_s8), %s2084_s21 }
  0x71   : > { %2825 = sst [smem:[#allocation16_spill]] %s2848_s24  ;;  %s39_s13 = ssub.s32 %s2080_s20, %s2848_s24 }
  0x72   : > { %p36_p1 = scmp.ge.s32.totalorder %s2850_s8, 2  ;;  %p2826_p2 = scmp.ne.s32.totalorder %s2815_s26, 0 }
  0x73   : > { %p2297_p10 = por %p51_p13, %p50_p11  ;;  %p1755_p6 = scmp.lt.s32.totalorder %s2088_s22, 4 }
  0x74   : > { %p2293_p4 = por %p2826_p2, %p50_p11  ;;  %s2852_s8 = smov (%p36_p1, %s2850_s8), 0 }
  0x75   : > { %2829 = sst [smem:[#allocation17_spill]] %s2852_s8  ;;  %s204_s30 = sand.u32 1, %s2068_s17  }
  0x76   : > { %s1605_s6 = sshll.u32 %s2080_s20, 4  ;;  %s38_s9 = ssub.s32 %s2084_s21, %s2852_s8 }
  0x77   : > { %s40_s11 = sor.u32 %s39_s13, %s38_s9  ;;  %s1563_s5 = sshll.u32 %s204_s30, 7 }
  0x78   : > { %p41_p8 = scmp.eq.s32.totalorder %s40_s11, 0  ;;  %s1566_s26 = sshll.u32 %s2084_s21, 5 }
  0x79   : > { %s208_s7 = scalar_lea.vmem [#allocation2], %s1563_s5  ;;  %s215_s1 = sadd.s32 %s1605_s6, %s1566_s26 }
  0x7a   : > { %s218_s28 = sshll.u32 %s208_s7, 4  ;;  %s1567_s2 = sshll.u32 %s215_s1, 7  ;;  %s2312_s28 = int_to_ptr.vmem [resolvable:$true] %s218_s28 }
  0x7b   : > { %s2310_s12 = scalar_select %p41_p8, %s2068_s17, %s43_s14  }
  0x7c   : > { %p2318_p0 = pnand %p1755_p6, %p2297_p10  ;;  %s2325_s13 = scalar_lea.hbm %s2799_s0, %s1567_s2 }
  0x7d   : > { %s2327_s14 = scalar_lea.sflag [#allocation3], %s204_s30  ;;  %s1952_s1 = scalar_lea.hbm %s2325_s13, 2048 }
  0x7e   : > { %p1953_p3 = scmp.ne.s32.totalorder %s2325_s13, %s1952_s1  ;;  %p1954_p5 = pneg %p2318_p0 }
  0x7f   : > { %s1957_s8 = scalar_lea.hbm %s2799_s0, 8192  ;;  %p1958_p12 = scmp.lt.u32.totalorder %s2325_s13, %s2799_s0 }
  0x80   : > { %p1955_p7 = pnand %p1954_p5, %p1953_p3  ;;  %p1959_p11 = scmp.lt.u32.totalorder %s1957_s8, %s1952_s1 }
  0x81   : > { %p1961_p1 = scmp.lt.u32.totalorder %s1952_s1, %s2325_s13 }
  0x82   : > { %p1956_p9 = pneg %p1955_p7  ;;  %p1960_p13 = por %p1959_p11, %p1958_p12 }
  0x84   : > { %p1962_p2 = por %p1961_p1, %p1960_p13 }
  0x86   : > { %p1963_p10 = pnand %p1962_p2, %p1956_p9 }
  0x88   : > { %1966 = shalt.err (!%p1963_p10)
}
  0x89   : > { %s1967_s30 = scalar_lea.vmem %s2312_s28, 2048  ;;  %s2093_s9 = smov [#allocation2]  }
  0x8a   : > { %p1968_p6 = scmp.ne.s32.totalorder %s2312_s28, %s1967_s30  ;;  %s1972_s11 = sshll.u32 %s2093_s9, 4  ;;  %s1973_s11 = int_to_ptr.vmem [resolvable:$false] %s1972_s11 }
  0x8b   : > { %s1974_s5 = scalar_lea.vmem %s1973_s11, 4096  ;;  %p1975_p7 = scmp.lt.s32.totalorder %s2312_s28, %s1973_s11 }
  0x8c   : > { %p1970_p8 = pnand %p1968_p6, %p1954_p5  ;;  %p1976_p12 = scmp.lt.s32.totalorder %s1974_s5, %s1967_s30 }
  0x8e   : > { %p1971_p3 = pneg %p1970_p8  ;;  %p1977_p11 = por %p1976_p12, %p1975_p7 }
  0x90   : > { %p1978_p13 = pnand %p1977_p11, %p1971_p3 }
  0x92   : > { %1981 = shalt.err (!%p1978_p13)
}
  0x93   : > { %s2094_s26 = smov 128   ;;  %s2095_s7 = smov 8  }
  0x94   : > { %1747 = dma.hbm_to_vmem [thread:$0]  (!%p2318_p0), %s2325_s13, 2048, %s2312_s28, %s2327_s14, %s2094_s26, %s2094_s26, %s2095_s7  }
  0x95   : > { %p2831_p5 = scmp.ne.s32.totalorder %s2819_s29, 0 }
  0x96   : > { %s2358_s1 = sand.u32 (!%p2831_p5), 1, %s2064_s16   ;;  %p2832_p9 = scmp.ne.s32.totalorder (!%p2831_p5), %s2816_s27, 0 }
  0x97   : > { %230 = sbr.rel (%p2831_p5) target bundleno = 755 (0x2f3), region = 36  ;;  %s1569_s10 = sshll.u32 (!%p2831_p5), %s2358_s1, 7 }
  0x98   : > { %s233_s24 = scalar_lea.sflag (!%p2831_p5), [#allocation3], %s2358_s1  ;;  %s2362_s8 = scalar_lea.vmem (!%p2831_p5), [#allocation2], %s1569_s10 }
  0x9e   : > { %2043 = dma.done.wait (%p2832_p9), %s233_s24, 2048  }
  0x9f   : > { %2045 = vsyncadd (%p2832_p9), %s233_s24, 4294965248  ;;  %p2833_p0 = scmp.ne.s32.totalorder %s2814_s25, 0 }
  0xa1   : > { %2047 = dma.done.wait (%p2833_p0), [#allocation6], 32  }
  0xa2   : > { %2049 = vsyncadd (%p2833_p0), [#allocation6], 4294967264 }
  0xa3   : > { %2051 = dma.done.wait (%p2833_p0), [#allocation9], 64  }
  0xa4   : > { %2053 = vsyncadd (%p2833_p0), [#allocation9], 4294967232  ;;  %vm290_vm0 = vcmask 130048   ;;  %v274_v0 = vld [vmem:[%s2362_s8] sm:$0xff]  ;;  %v276_v1 = vld [vmem:[%s2362_s8 + $0x10] sm:$0xff]  ;;  %vm2097_vm1 = vmmov 0  }
  0xa5   : > { %v275_v2 = vld [vmem:[%s2362_s8 + $0x8] sm:$0xff]  ;;  %v291_v3 = vsel %vm290_vm0, %v274_v0, 0.0  ;;  %v297_v4 = vsel %vm290_vm0, %v276_v1, 0.0  ;;  %v277_v5 = vld [vmem:[%s2362_s8 + $0x18] sm:$0xff]  ;;  %v278_v8 = vld [vmem:[%s2362_s8 + $0x20] sm:$0xff]  ;;  %s1573_s3 = sshll.u32 %s2358_s1, 5 }
  0xa6   : > { %292 = vadd.xlane.f32.xlu0 %v291_v3  ;;  %298 = vadd.xlane.f32.xlu1 %v297_v4  ;;  %v294_v6 = vsel %vm290_vm0, %v275_v2, 0.0  ;;  %v300_v7 = vsel %vm290_vm0, %v277_v5, 0.0  ;;  %v279_v9 = vld [vmem:[%s2362_s8 + $0x28] sm:$0xff]  ;;  %v303_v10 = vsel %vm290_vm0, %v278_v8, 0.0  ;;  %v2389_v12 = vld [vmem:[%s2362_s8 + $0x30] sm:$0xff]  ;;  %v2392_v13 = vld [vmem:[%s2362_s8 + $0x38] sm:$0xff] }
  0xa7   : > { %v306_v11 = vsel %vm290_vm0, %v279_v9, 0.0  ;;  %v309_v14 = vsel %vm290_vm0, %v2389_v12, 0.0  ;;  %v312_v15 = vsel %vm290_vm0, %v2392_v13, 0.0  ;;  %v2399_v16 = vld [vmem:[%s2362_s8 + $0x40] sm:$0xff]  ;;  %v2402_v17 = vld [vmem:[%s2362_s8 + $0x48] sm:$0xff]  ;;  %v2409_v20 = vld [vmem:[%s2362_s8 + $0x50] sm:$0xff] }
  0xa8   : > { %v315_v18 = vsel %vm290_vm0, %v2399_v16, 0.0  ;;  %v318_v19 = vsel %vm290_vm0, %v2402_v17, 0.0  ;;  %v2412_v21 = vld [vmem:[%s2362_s8 + $0x58] sm:$0xff]  ;;  %v321_v22 = vsel %vm290_vm0, %v2409_v20, 0.0  ;;  %v2419_v24 = vld [vmem:[%s2362_s8 + $0x60] sm:$0xff]  ;;  %v2422_v25 = vld [vmem:[%s2362_s8 + $0x68] sm:$0xff] }
  0xa9   : > { %v324_v23 = vsel %vm290_vm0, %v2412_v21, 0.0  ;;  %v327_v26 = vsel %vm290_vm0, %v2419_v24, 0.0  ;;  %v330_v27 = vsel %vm290_vm0, %v2422_v25, 0.0  ;;  %v2429_v28 = vld [vmem:[%s2362_s8 + $0x70] sm:$0xff]  ;;  %v2432_v29 = vld [vmem:[%s2362_s8 + $0x78] sm:$0xff]  ;;  %vm2550_vm2 = vmpackc.low %vm290_vm0, %vm290_vm0  ;;  %vm655_vm3 = vcmask 122880  }
  0xaa   : > { %295 = vadd.xlane.f32.xlu0 %v294_v6  ;;  %301 = vadd.xlane.f32.xlu1 %v300_v7  ;;  %v333_v30 = vsel %vm290_vm0, %v2429_v28, 0.0  ;;  %v336_v31 = vsel %vm290_vm0, %v2432_v29, 0.0  ;;  %s2650_s25 = scalar_lea.vmem [#allocation10], %s1573_s3  ;;  %s1601_s27 = sshll.u32 %s2076_s19, 3 }
  0xab   : > { %s1435_s19 = sadd.s32 %s2072_s18, %s1601_s27  ;;  %s1438_s18 = sshll.u32 %s2650_s25, 4  ;;  %s2739_s18 = int_to_ptr.vmem [resolvable:$true] %s1438_s18 }
  0xac   : > { %s1602_s29 = sshll.u32 %s1435_s19, 7  ;;  %s1424_s2 = scalar_lea.sflag [#allocation4], %s2358_s1 }
  0xad   : > { %s2737_s14 = scalar_lea.hbm %s2803_s4, %s1602_s29  ;;  %s1982_s6 = scalar_lea.vmem %s2739_s18, 512 }
  0xae   : > { %304 = vadd.xlane.f32.xlu0 %v303_v10  ;;  %307 = vadd.xlane.f32.xlu1 %v306_v11  ;;  %p1983_p1 = scmp.ne.s32.totalorder %s2739_s18, %s1982_s6  ;;  %s2100_s30 = smov [#allocation10]  }
  0xaf   : > { %s1986_s9 = sshll.u32 %s2100_s30, 4  ;;  %s1987_s9 = int_to_ptr.vmem [resolvable:$false] %s1986_s9 }
  0xb0   : > { %p1984_p2 = pnand %p1983_p1, %p2293_p4  ;;  %s1988_s11 = scalar_lea.vmem %s1987_s9, 1024 }
  0xb1   : > { %p1989_p6 = scmp.lt.s32.totalorder %s2739_s18, %s1987_s9  ;;  %p1990_p8 = scmp.lt.s32.totalorder %s1988_s11, %s1982_s6 }
  0xb2   : > { %310 = vadd.xlane.f32.xlu0 %v309_v14  ;;  %313 = vadd.xlane.f32.xlu1 %v312_v15  ;;  %p1985_p10 = pneg %p1984_p2 }
  0xb3   : > { %p1991_p3 = por %p1990_p8, %p1989_p6 }
  0xb5   : > { %p1992_p7 = pnand %p1991_p3, %p1985_p10 }
  0xb6   : > { %316 = vadd.xlane.f32.xlu0 %v315_v18  ;;  %319 = vadd.xlane.f32.xlu1 %v318_v19 }
  0xba   : > { %322 = vadd.xlane.f32.xlu0 %v321_v22  ;;  %325 = vadd.xlane.f32.xlu1 %v324_v23 }
  0xbe   : > { %328 = vadd.xlane.f32.xlu0 %v327_v26  ;;  %331 = vadd.xlane.f32.xlu1 %v330_v27 }
  0xc2   : > { %334 = vadd.xlane.f32.xlu0 %v333_v30  ;;  %337 = vadd.xlane.f32.xlu1 %v336_v31 }
 0x133   : > { %v293_v32 = vpop.xlane.xlu0 %292  ;;  %v299_v33 = vpop.xlane.xlu1 %298 }
 0x134   : > { %v340_v34 = vmul.f32 0.0625, %v293_v32  ;;  %v342_v35 = vmul.f32 0.0625, %v299_v33 }
 0x136   : > { %v2438_v36 = vsub.f32 %v274_v0, %v340_v34  ;;  %v2440_v37 = vsub.f32 %v276_v1, %v342_v35 }
 0x137   : > { %v296_v38 = vpop.xlane.xlu0 %295  ;;  %v302_v39 = vpop.xlane.xlu1 %301 }
 0x138   : > { %v341_v40 = vmul.f32 0.0625, %v296_v38  ;;  %v343_v41 = vmul.f32 0.0625, %v302_v39  ;;  %v372_v42 = vmul.f32 %v2438_v36, %v2438_v36  ;;  %v374_v43 = vmul.f32 %v2440_v37, %v2440_v37 }
 0x13a   : > { %v2446_v44 = vsub.f32 %v275_v2, %v341_v40  ;;  %v2448_v45 = vsub.f32 %v277_v5, %v343_v41  ;;  %v388_v46 = vsel %vm290_vm0, %v372_v42, 0.0  ;;  %v394_v49 = vsel %vm290_vm0, %v374_v43, 0.0 }
 0x13b   : > { %389 = vadd.xlane.f32.xlu0 %v388_v46  ;;  %v305_v47 = vpop.xlane.xlu0 %304  ;;  %v308_v48 = vpop.xlane.xlu1 %307 }
 0x13c   : > { %v344_v50 = vmul.f32 0.0625, %v305_v47  ;;  %v345_v51 = vmul.f32 0.0625, %v308_v48  ;;  %v373_v52 = vmul.f32 %v2446_v44, %v2446_v44  ;;  %v375_v53 = vmul.f32 %v2448_v45, %v2448_v45 }
 0x13e   : > { %v2456_v54 = vsub.f32 %v278_v8, %v344_v50  ;;  %v2458_v55 = vsub.f32 %v279_v9, %v345_v51  ;;  %v391_v56 = vsel %vm290_vm0, %v373_v52, 0.0  ;;  %v397_v59 = vsel %vm290_vm0, %v375_v53, 0.0 }
 0x13f   : > { %395 = vadd.xlane.f32.xlu0 %v394_v49  ;;  %392 = vadd.xlane.f32.xlu1 %v391_v56  ;;  %v311_v57 = vpop.xlane.xlu0 %310  ;;  %v314_v58 = vpop.xlane.xlu1 %313  ;;  %v2098_v53 = vmov 0.0  }
 0x140   : > { %v346_v60 = vmul.f32 0.0625, %v311_v57  ;;  %v347_v61 = vmul.f32 0.0625, %v314_v58  ;;  %v376_v62 = vmul.f32 %v2456_v54, %v2456_v54  ;;  %v377_v63 = vmul.f32 %v2458_v55, %v2458_v55  ;;  %1634 = vmatprep.mubr.msk.f32.mxu0 %vm2097_vm1, %v2098_v53  ;;  %1641 = vmatprep.mubr.msk.f32.mxu1 %vm2097_vm1, %v2098_v53 }
 0x142   : > { %v2467_v0 = vsub.f32 %v2389_v12, %v346_v60  ;;  %v2470_v1 = vsub.f32 %v2392_v13, %v347_v61  ;;  %v400_v2 = vsel %vm290_vm0, %v376_v62, 0.0  ;;  %v403_v5 = vsel %vm290_vm0, %v377_v63, 0.0 }
 0x143   : > { %398 = vadd.xlane.f32.xlu1 %v397_v59  ;;  %401 = vadd.xlane.f32.xlu0 %v400_v2  ;;  %v317_v3 = vpop.xlane.xlu0 %316  ;;  %v320_v4 = vpop.xlane.xlu1 %319 }
 0x144   : > { %v348_v6 = vmul.f32 0.0625, %v317_v3  ;;  %v349_v7 = vmul.f32 0.0625, %v320_v4  ;;  %v378_v8 = vmul.f32 %v2467_v0, %v2467_v0  ;;  %v379_v9 = vmul.f32 %v2470_v1, %v2470_v1 }
 0x146   : > { %v2479_v10 = vsub.f32 %v2399_v16, %v348_v6  ;;  %v2482_v11 = vsub.f32 %v2402_v17, %v349_v7  ;;  %v406_v12 = vsel %vm290_vm0, %v378_v8, 0.0  ;;  %v409_v15 = vsel %vm290_vm0, %v379_v9, 0.0 }
 0x147   : > { %404 = vadd.xlane.f32.xlu1 %v403_v5  ;;  %407 = vadd.xlane.f32.xlu0 %v406_v12  ;;  %v323_v13 = vpop.xlane.xlu0 %322  ;;  %v326_v14 = vpop.xlane.xlu1 %325 }
 0x148   : > { %v350_v18 = vmul.f32 0.0625, %v323_v13  ;;  %v351_v19 = vmul.f32 0.0625, %v326_v14  ;;  %v380_v22 = vmul.f32 %v2479_v10, %v2479_v10  ;;  %v381_v16 = vmul.f32 %v2482_v11, %v2482_v11 }
 0x14a   : > { %v2491_v23 = vsub.f32 %v2409_v20, %v350_v18  ;;  %v2494_v17 = vsub.f32 %v2412_v21, %v351_v19  ;;  %v412_v26 = vsel %vm290_vm0, %v380_v22, 0.0  ;;  %v415_v31 = vsel %vm290_vm0, %v381_v16, 0.0 }
 0x14b   : > { %410 = vadd.xlane.f32.xlu1 %v409_v15  ;;  %413 = vadd.xlane.f32.xlu0 %v412_v26  ;;  %v329_v27 = vpop.xlane.xlu0 %328  ;;  %v332_v30 = vpop.xlane.xlu1 %331 }
 0x14c   : > { %v352_v32 = vmul.f32 0.0625, %v329_v27  ;;  %v353_v33 = vmul.f32 0.0625, %v332_v30  ;;  %v382_v34 = vmul.f32 %v2491_v23, %v2491_v23  ;;  %v383_v20 = vmul.f32 %v2494_v17, %v2494_v17  ;;  %v2535_v27 = vld [vmem:[#allocation5] ss:$0 sm:$0xff] }
 0x14e   : > { %v2503_v35 = vsub.f32 %v2419_v24, %v352_v32  ;;  %v2506_v21 = vsub.f32 %v2422_v25, %v353_v33  ;;  %v418_v38 = vsel %vm290_vm0, %v382_v34, 0.0  ;;  %v421_v41 = vsel %vm290_vm0, %v383_v20, 0.0 }
 0x14f   : > { %416 = vadd.xlane.f32.xlu1 %v415_v31  ;;  %419 = vadd.xlane.f32.xlu0 %v418_v38  ;;  %v335_v39 = vpop.xlane.xlu0 %334  ;;  %v338_v40 = vpop.xlane.xlu1 %337 }
 0x150   : > { %v354_v42 = vmul.f32 0.0625, %v335_v39  ;;  %v355_v43 = vmul.f32 0.0625, %v338_v40  ;;  %v384_v46 = vmul.f32 %v2503_v35, %v2503_v35  ;;  %v385_v24 = vmul.f32 %v2506_v21, %v2506_v21 }
 0x152   : > { %v2515_v47 = vsub.f32 %v2429_v28, %v354_v42  ;;  %v2518_v25 = vsub.f32 %v2432_v29, %v355_v43  ;;  %v424_v48 = vsel %vm290_vm0, %v384_v46, 0.0  ;;  %v427_v49 = vsel %vm290_vm0, %v385_v24, 0.0 }
 0x153   : > { %422 = vadd.xlane.f32.xlu1 %v421_v41  ;;  %425 = vadd.xlane.f32.xlu0 %v424_v48  ;;  %v2096_v29 = vmov 0.0|0.0  }
 0x154   : > { %v386_v50 = vmul.f32 %v2515_v47, %v2515_v47  ;;  %v387_v51 = vmul.f32 %v2518_v25, %v2518_v25  ;;  %1686 = vmatprep.subr.bf16.mxu0 %v2096_v29  ;;  %1690 = vmatprep.subr.bf16.mxu1 %v2096_v29 }
 0x156   : > { %v430_v52 = vsel %vm290_vm0, %v386_v50, 0.0  ;;  %v433_v28 = vsel %vm290_vm0, %v387_v51, 0.0 }
 0x157   : > { %428 = vadd.xlane.f32.xlu1 %v427_v49  ;;  %431 = vadd.xlane.f32.xlu0 %v430_v52 }
 0x15b   : > { %434 = vadd.xlane.f32.xlu1 %v433_v28 }
 0x1c8   : > { %v390_v56 = vpop.xlane.xlu0 %389 }
 0x1c9   : > { %v436_v57 = vmul.f32 0.0625, %v390_v56 }
 0x1cb   : > { %v452_v58 = vadd.f32 1e-05, %v436_v57 }
 0x1cc   : > { %v393_v59 = vpop.xlane.xlu1 %392  ;;  %v396_v60 = vpop.xlane.xlu0 %395 }
 0x1cd   : > { %1836 = vrsqrt.f32 %v452_v58  ;;  %v437_v61 = vmul.f32 0.0625, %v393_v59  ;;  %v438_v62 = vmul.f32 0.0625, %v396_v60 }
 0x1cf   : > { %v453_v63 = vadd.f32 1e-05, %v437_v61  ;;  %v454_v2 = vadd.f32 1e-05, %v438_v62 }
 0x1d0   : > { %v399_v3 = vpop.xlane.xlu1 %398  ;;  %v402_v4 = vpop.xlane.xlu0 %401 }
 0x1d1   : > { %1838 = vrsqrt.f32 %v453_v63  ;;  %v439_v5 = vmul.f32 0.0625, %v399_v3  ;;  %v440_v6 = vmul.f32 0.0625, %v402_v4 }
 0x1d2   : > { %1840 = vrsqrt.f32 %v454_v2 }
 0x1d3   : > { %v455_v7 = vadd.f32 1e-05, %v439_v5  ;;  %v456_v8 = vadd.f32 1e-05, %v440_v6 }
 0x1d4   : > { %v405_v9 = vpop.xlane.xlu1 %404  ;;  %v408_v12 = vpop.xlane.xlu0 %407 }
 0x1d5   : > { %1842 = vrsqrt.f32 %v455_v7  ;;  %v441_v13 = vmul.f32 0.0625, %v405_v9  ;;  %v442_v14 = vmul.f32 0.0625, %v408_v12 }
 0x1d6   : > { %1844 = vrsqrt.f32 %v456_v8 }
 0x1d7   : > { %v1837_v15 = vpop.eup %1836  ;;  %v457_v18 = vadd.f32 1e-05, %v441_v13  ;;  %v458_v19 = vadd.f32 1e-05, %v442_v14 }
 0x1d8   : > { %v411_v22 = vpop.xlane.xlu1 %410  ;;  %v414_v16 = vpop.xlane.xlu0 %413  ;;  %v484_v26 = vmul.f32 %v1837_v15, %v2438_v36  ;;  %v2539_v36 = vld [vmem:[#allocation7] ss:$0 sm:$0xff] }
 0x1d9   : > { %1846 = vrsqrt.f32 %v457_v18  ;;  %v443_v30 = vmul.f32 0.0625, %v411_v22  ;;  %v444_v31 = vmul.f32 0.0625, %v414_v16 }
 0x1da   : > { %1848 = vrsqrt.f32 %v458_v19  ;;  %v507_v41 = vmul.f32 %v2535_v27, %v484_v26 }
 0x1db   : > { %v1839_v32 = vpop.eup %1838  ;;  %v459_v33 = vadd.f32 1e-05, %v443_v30  ;;  %v460_v34 = vadd.f32 1e-05, %v444_v31 }
 0x1dc   : > { %v1841_v20 = vpop.eup %1840  ;;  %v417_v38 = vpop.xlane.xlu1 %416  ;;  %v485_v40 = vmul.f32 %v1839_v32, %v2446_v44  ;;  %v530_v44 = vadd.f32 %v2539_v36, %v507_v41 }
 0x1dd   : > { %v420_v39 = vpop.xlane.xlu0 %419  ;;  %1850 = vrsqrt.f32 %v459_v33  ;;  %v445_v42 = vmul.f32 0.0625, %v417_v38  ;;  %v486_v46 = vmul.f32 %v1841_v20, %v2440_v37 }
 0x1de   : > { %v446_v43 = vmul.f32 0.0625, %v420_v39  ;;  %1852 = vrsqrt.f32 %v460_v34  ;;  %v508_v24 = vmul.f32 %v2535_v27, %v485_v40 }
 0x1df   : > { %v1843_v48 = vpop.eup %1842  ;;  %v461_v49 = vadd.f32 1e-05, %v445_v42  ;;  %v509_v58 = vmul.f32 %v2535_v27, %v486_v46 }
 0x1e0   : > { %v462_v50 = vadd.f32 1e-05, %v446_v43  ;;  %v1845_v51 = vpop.eup %1844  ;;  %v423_v52 = vpop.xlane.xlu1 %422  ;;  %v531_v56 = vadd.f32 %v2539_v36, %v508_v24  ;;  %v487_v57 = vmul.f32 %v1843_v48, %v2448_v45 }
 0x1e1   : > { %v426_v28 = vpop.xlane.xlu0 %425  ;;  %v488_v59 = vmul.f32 %v1845_v51, %v2456_v54  ;;  %1854 = vrsqrt.f32 %v461_v49  ;;  %v447_v37 = vmul.f32 0.0625, %v423_v52  ;;  %v532_v8 = vadd.f32 %v2539_v36, %v509_v58 }
 0x1e2   : > { %v448_v60 = vmul.f32 0.0625, %v426_v28  ;;  %1856 = vrsqrt.f32 %v462_v50  ;;  %v1687_v62 = vpack.c.bf16 %v531_v56, %v530_v44  ;;  %v510_v63 = vmul.f32 %v2535_v27, %v487_v57 }
 0x1e3   : > { %v1847_v2 = vpop.eup %1846  ;;  %v463_v3 = vadd.f32 1e-05, %v447_v37  ;;  %v511_v5 = vmul.f32 %v2535_v27, %v488_v59 }
 0x1e4   : > { %v464_v45 = vadd.f32 1e-05, %v448_v60  ;;  %v1849_v4 = vpop.eup %1848  ;;  %v489_v54 = vmul.f32 %v1847_v2, %v2458_v55  ;;  %v429_v6 = vpop.xlane.xlu1 %428  ;;  %1689 = vmatpush3.bf16.xpose.msk.msra.mxu0 %vm2550_vm2, %v1687_v62  ;;  %v533_v9 = vadd.f32 %v2539_v36, %v510_v63 }
 0x1e5   : > { %v432_v7 = vpop.xlane.xlu0 %431  ;;  %v490_v12 = vmul.f32 %v1849_v4, %v2467_v0  ;;  %1858 = vrsqrt.f32 %v463_v3  ;;  %v449_v13 = vmul.f32 0.0625, %v429_v6  ;;  %1694 = vmatprep.subr.bf16.mxu0 %v2096_v29  ;;  %v2568_v0 = vld [vmem:[#allocation8] sm:$0xf]  ;;  %v534_v32 = vadd.f32 %v2539_v36, %v511_v5 }
 0x1e6   : > { %v450_v14 = vmul.f32 0.0625, %v432_v7  ;;  %v512_v15 = vmul.f32 %v2535_v27, %v489_v54  ;;  %1860 = vrsqrt.f32 %v464_v45  ;;  %v1691_v55 = vpack.c.bf16 %v533_v9, %v532_v8 }
 0x1e7   : > { %v1851_v18 = vpop.eup %1850  ;;  %v465_v19 = vadd.f32 1e-05, %v449_v13  ;;  %v513_v26 = vmul.f32 %v2535_v27, %v490_v12 }
 0x1e8   : > { %v466_v22 = vadd.f32 1e-05, %v450_v14  ;;  %v1853_v16 = vpop.eup %1852  ;;  %v491_v30 = vmul.f32 %v1851_v18, %v2470_v1  ;;  %v435_v31 = vpop.xlane.xlu1 %434  ;;  %1693 = vmatpush3.bf16.xpose.msk.msra.mxu1 %vm2550_vm2, %v1691_v55  ;;  %v535_v33 = vadd.f32 %v2539_v36, %v512_v15 }
 0x1e9   : > { %v492_v34 = vmul.f32 %v1853_v16, %v2479_v10  ;;  %1862 = vrsqrt.f32 %v465_v19  ;;  %v451_v20 = vmul.f32 0.0625, %v435_v31  ;;  %1698 = vmatprep.subr.bf16.mxu1 %v2096_v29  ;;  %v536_v10 = vadd.f32 %v2539_v36, %v513_v26 }
 0x1ea   : > { %v514_v38 = vmul.f32 %v2535_v27, %v491_v30  ;;  %1864 = vrsqrt.f32 %v466_v22  ;;  %v1695_v1 = vpack.c.bf16 %v535_v33, %v534_v32 }
 0x1eb   : > { %v1855_v39 = vpop.eup %1854  ;;  %v515_v40 = vmul.f32 %v2535_v27, %v492_v34  ;;  %v467_v41 = vadd.f32 1e-05, %v451_v20  ;;  %1635 = vmatmul.mubr.msk.f32.vlgmr.msra.gmra.mrb[0].mxu0 %vm290_vm0, %v2568_v0 }
 0x1ec   : > { %v1857_v42 = vpop.eup %1856  ;;  %v493_v43 = vmul.f32 %v1855_v39, %v2482_v11  ;;  %1697 = vmatpush3.bf16.xpose.msk.msra.mxu0 %vm2550_vm2, %v1695_v1  ;;  %v537_v46 = vadd.f32 %v2539_v36, %v514_v38  ;;  %1648 = vmatprep.mubr.msk.f32.mxu0 %vm2097_vm1, %v2098_v53 }
 0x1ed   : > { %v494_v24 = vmul.f32 %v1857_v42, %v2491_v23  ;;  %1866 = vrsqrt.f32 %v467_v41  ;;  %1702 = vmatprep.subr.bf16.mxu0 %v2096_v29  ;;  %v538_v11 = vadd.f32 %v2539_v36, %v515_v40 }
 0x1ee   : > { %v516_v48 = vmul.f32 %v2535_v27, %v493_v43  ;;  %v1699_v49 = vpack.c.bf16 %v537_v46, %v536_v10 }
 0x1ef   : > { %v1859_v50 = vpop.eup %1858  ;;  %1642 = vmatmul.mubr.msk.f32.vlgmr.msra.gmra.mrb[0].mxu1 %vm290_vm0, %v2568_v0  ;;  %v517_v52 = vmul.f32 %v2535_v27, %v494_v24 }
 0x1f0   : > { %v1861_v51 = vpop.eup %1860  ;;  %v495_v28 = vmul.f32 %v1859_v50, %v2494_v17  ;;  %1701 = vmatpush3.bf16.xpose.msk.msra.mxu1 %vm2550_vm2, %v1699_v49  ;;  %v539_v23 = vadd.f32 %v2539_v36, %v516_v48  ;;  %1655 = vmatprep.mubr.msk.f32.mxu1 %vm2097_vm1, %v2098_v53 }
 0x1f1   : > { %v496_v44 = vmul.f32 %v1861_v51, %v2503_v35  ;;  %1706 = vmatprep.subr.bf16.mxu1 %v2096_v29  ;;  %v540_v60 = vadd.f32 %v2539_v36, %v517_v52 }
 0x1f2   : > { %v518_v56 = vmul.f32 %v2535_v27, %v495_v28  ;;  %v1703_v57 = vpack.c.bf16 %v539_v23, %v538_v11 }
 0x1f3   : > { %v1863_v58 = vpop.eup %1862  ;;  %v519_v59 = vmul.f32 %v2535_v27, %v496_v44  ;;  %1649 = vmatmul.mubr.msk.f32.vlgmr.msra.gmra.mrb[2].mxu0 %vm290_vm0, %v2568_v0 }
 0x1f4   : > { %v1865_v17 = vpop.eup %1864  ;;  %v497_v37 = vmul.f32 %v1863_v58, %v2506_v21  ;;  %1705 = vmatpush3.bf16.xpose.msk.msra.mxu0 %vm2550_vm2, %v1703_v57  ;;  %v541_v35 = vadd.f32 %v2539_v36, %v518_v56  ;;  %1662 = vmatprep.mubr.msk.f32.mxu0 %vm2097_vm1, %v2098_v53 }
 0x1f5   : > { %v498_v62 = vmul.f32 %v1865_v17, %v2515_v47  ;;  %1710 = vmatprep.subr.bf16.mxu0 %v2096_v29  ;;  %v542_v21 = vadd.f32 %v2539_v36, %v519_v59 }
 0x1f6   : > { %v520_v63 = vmul.f32 %v2535_v27, %v497_v37  ;;  %v1707_v2 = vpack.c.bf16 %v541_v35, %v540_v60 }
 0x1f7   : > { %v1867_v3 = vpop.eup %1866  ;;  %1656 = vmatmul.mubr.msk.f32.vlgmr.msra.gmra.mrb[2].mxu1 %vm290_vm0, %v2568_v0  ;;  %v521_v45 = vmul.f32 %v2535_v27, %v498_v62 }
 0x1f8   : > { %v499_v4 = vmul.f32 %v1867_v3, %v2518_v25  ;;  %1709 = vmatpush3.bf16.xpose.msk.msra.mxu1 %vm2550_vm2, %v1707_v2  ;;  %v543_v47 = vadd.f32 %v2539_v36, %v520_v63  ;;  %1669 = vmatprep.mubr.msk.f32.mxu1 %vm2097_vm1, %v2098_v53 }
 0x1f9   : > { %1714 = vmatprep.subr.bf16.mxu1 %v2096_v29  ;;  %v544_v25 = vadd.f32 %v2539_v36, %v521_v45  ;;  %v2099_v29 = vmov 1966171168  }
 0x1fa   : > { %v522_v5 = vmul.f32 %v2535_v27, %v499_v4  ;;  %v1711_v54 = vpack.c.bf16 %v543_v47, %v542_v21  ;;  %v628_v27 = vunpack.c.l.s4 %v2099_v29 }
 0x1fb   : > { %1663 = vmatmul.mubr.msk.f32.vlgmr.msra.gmra.mrb[4].mxu0 %vm290_vm0, %v2568_v0 }
 0x1fc   : > { %1713 = vmatpush3.bf16.xpose.msk.msra.mxu0 %vm2550_vm2, %v1711_v54  ;;  %v545_v6 = vadd.f32 %v2539_v36, %v522_v5  ;;  %1676 = vmatprep.mubr.msk.f32.mxu0 %vm2097_vm1, %v2098_v53  ;;  %v630_v36 = vlaneseq  ;;  %v629_v8 = vunpack.c.0.s8 %v628_v27 }
 0x1fe   : > { %v1715_v7 = vpack.c.bf16 %v545_v6, %v544_v25  ;;  %v631_v9 = vshrl.u32 %v630_v36, 7 }
 0x1ff   : > { %1670 = vmatmul.mubr.msk.f32.vlgmr.msra.gmra.mrb[4].mxu1 %vm290_vm0, %v2568_v0 }
 0x200   : > { %1717 = vmatpush3.bf16.xpose.msk.msra.mxu1 %vm2550_vm2, %v1715_v7  ;;  %1683 = vmatprep.mubr.msk.f32.mxu1 %vm2097_vm1, %v2098_v53  ;;  %v2644_v12 = vsub.s32 %v629_v8, %v631_v9 }
 0x203   : > { %1677 = vmatmul.mubr.msk.f32.vlgmr.msra.gmra.mrb[6].mxu0 %vm290_vm0, %v2568_v0 }
 0x207   : > { %1684 = vmatmul.mubr.msk.f32.vlgmr.msra.gmra.mrb[6].mxu1 %vm290_vm0, %v2568_v0 }
 0x2be   : > { %v622_v13 = vpop.f32.mrb[0].mxu0 }
 0x2bf   : > { %v633_v61 = vrot.slane %v622_v13, %v2644_v12  ;;  %v1636_v14 = vpop.f32.mrb[1].mxu0 }
 0x2c1   : > { %v634_v53 = vcombine.high %v633_v61, %v633_v61  ;;  %v641_v15 = vrot.slane %v633_v61, %v2644_v12 }
 0x2c2   : > { %v732_v55 = vpop.f32.mrb[0].mxu1 }
 0x2c3   : > { %v648_v18 = vrot.slane %v634_v53, %v2644_v12  ;;  %v649_v19 = vcombine.high %v641_v15, %v641_v15  ;;  %656 = vst.msk [vmem:[%s2650_s25] sm:$0x1] %vm655_vm3, %v641_v15  ;;  %v743_v22 = vrot.slane %v732_v55, %v2644_v12  ;;  %v1643_v16 = vpop.f32.mrb[1].mxu1 }
 0x2c5   : > { %v650_v26 = vcombine.high %v648_v18, %v648_v18  ;;  %657 = vst.msk [vmem:[%s2650_s25 + $0x8] sm:$0x1] %vm655_vm3, %v648_v18  ;;  %658 = vst.msk [vmem:[%s2650_s25 + $0x10] sm:$0x1] %vm655_vm3, %v649_v19  ;;  %v744_v30 = vcombine.high %v743_v22, %v743_v22  ;;  %v751_v31 = vrot.slane %v743_v22, %v2644_v12 }
 0x2c6   : > { %v841_v0 = vpop.f32.mrb[2].mxu0 }
 0x2c7   : > { %659 = vst.msk [vmem:[%s2650_s25 + $0x18] sm:$0x1] %vm655_vm3, %v650_v26  ;;  %v758_v32 = vrot.slane %v744_v30, %v2644_v12  ;;  %v759_v33 = vcombine.high %v751_v31, %v751_v31  ;;  %765 = vst.msk [vmem:[%s2650_s25 + $0x1] sm:$0x1] %vm655_vm3, %v751_v31  ;;  %v852_v34 = vrot.slane %v841_v0, %v2644_v12  ;;  %v1650_v20 = vpop.f32.mrb[3].mxu0 }
 0x2c9   : > { %v760_v38 = vcombine.high %v758_v32, %v758_v32  ;;  %766 = vst.msk [vmem:[%s2650_s25 + $0x9] sm:$0x1] %vm655_vm3, %v758_v32  ;;  %767 = vst.msk [vmem:[%s2650_s25 + $0x11] sm:$0x1] %vm655_vm3, %v759_v33  ;;  %v853_v1 = vcombine.high %v852_v34, %v852_v34  ;;  %v860_v39 = vrot.slane %v852_v34, %v2644_v12 }
 0x2ca   : > { %v950_v40 = vpop.f32.mrb[2].mxu1 }
 0x2cb   : > { %768 = vst.msk [vmem:[%s2650_s25 + $0x19] sm:$0x1] %vm655_vm3, %v760_v38  ;;  %v867_v41 = vrot.slane %v853_v1, %v2644_v12  ;;  %v868_v42 = vcombine.high %v860_v39, %v860_v39  ;;  %874 = vst.msk [vmem:[%s2650_s25 + $0x2] sm:$0x1] %vm655_vm3, %v860_v39  ;;  %v961_v43 = vrot.slane %v950_v40, %v2644_v12  ;;  %v1657_v10 = vpop.f32.mrb[3].mxu1 }
 0x2cd   : > { %v869_v46 = vcombine.high %v867_v41, %v867_v41  ;;  %875 = vst.msk [vmem:[%s2650_s25 + $0xa] sm:$0x1] %vm655_vm3, %v867_v41  ;;  %876 = vst.msk [vmem:[%s2650_s25 + $0x12] sm:$0x1] %vm655_vm3, %v868_v42  ;;  %v962_v24 = vcombine.high %v961_v43, %v961_v43  ;;  %v969_v48 = vrot.slane %v961_v43, %v2644_v12 }
 0x2ce   : > { %v1059_v49 = vpop.f32.mrb[4].mxu0 }
 0x2cf   : > { %877 = vst.msk [vmem:[%s2650_s25 + $0x1a] sm:$0x1] %vm655_vm3, %v869_v46  ;;  %v976_v50 = vrot.slane %v962_v24, %v2644_v12  ;;  %v977_v11 = vcombine.high %v969_v48, %v969_v48  ;;  %983 = vst.msk [vmem:[%s2650_s25 + $0x3] sm:$0x1] %vm655_vm3, %v969_v48  ;;  %v1070_v51 = vrot.slane %v1059_v49, %v2644_v12  ;;  %v1664_v52 = vpop.f32.mrb[5].mxu0 }
 0x2d1   : > { %v978_v28 = vcombine.high %v976_v50, %v976_v50  ;;  %984 = vst.msk [vmem:[%s2650_s25 + $0xb] sm:$0x1] %vm655_vm3, %v976_v50  ;;  %985 = vst.msk [vmem:[%s2650_s25 + $0x13] sm:$0x1] %vm655_vm3, %v977_v11  ;;  %v1071_v23 = vcombine.high %v1070_v51, %v1070_v51  ;;  %v1078_v44 = vrot.slane %v1070_v51, %v2644_v12 }
 0x2d2   : > { %v1168_v56 = vpop.f32.mrb[4].mxu1 }
 0x2d3   : > { %986 = vst.msk [vmem:[%s2650_s25 + $0x1b] sm:$0x1] %vm655_vm3, %v978_v28  ;;  %v1085_v57 = vrot.slane %v1071_v23, %v2644_v12  ;;  %v1086_v58 = vcombine.high %v1078_v44, %v1078_v44  ;;  %1092 = vst.msk [vmem:[%s2650_s25 + $0x4] sm:$0x1] %vm655_vm3, %v1078_v44  ;;  %v1179_v59 = vrot.slane %v1168_v56, %v2644_v12  ;;  %v1671_v17 = vpop.f32.mrb[5].mxu1 }
 0x2d5   : > { %v1087_v37 = vcombine.high %v1085_v57, %v1085_v57  ;;  %1093 = vst.msk [vmem:[%s2650_s25 + $0xc] sm:$0x1] %vm655_vm3, %v1085_v57  ;;  %1094 = vst.msk [vmem:[%s2650_s25 + $0x14] sm:$0x1] %vm655_vm3, %v1086_v58  ;;  %v1180_v60 = vcombine.high %v1179_v59, %v1179_v59  ;;  %v1187_v35 = vrot.slane %v1179_v59, %v2644_v12 }
 0x2d6   : > { %v1277_v62 = vpop.f32.mrb[6].mxu0 }
 0x2d7   : > { %1095 = vst.msk [vmem:[%s2650_s25 + $0x1c] sm:$0x1] %vm655_vm3, %v1087_v37  ;;  %v1194_v63 = vrot.slane %v1180_v60, %v2644_v12  ;;  %v1195_v2 = vcombine.high %v1187_v35, %v1187_v35  ;;  %1201 = vst.msk [vmem:[%s2650_s25 + $0x5] sm:$0x1] %vm655_vm3, %v1187_v35  ;;  %v1288_v3 = vrot.slane %v1277_v62, %v2644_v12  ;;  %v1678_v21 = vpop.f32.mrb[7].mxu0 }
 0x2d9   : > { %v1196_v45 = vcombine.high %v1194_v63, %v1194_v63  ;;  %1202 = vst.msk [vmem:[%s2650_s25 + $0xd] sm:$0x1] %vm655_vm3, %v1194_v63  ;;  %1203 = vst.msk [vmem:[%s2650_s25 + $0x15] sm:$0x1] %vm655_vm3, %v1195_v2  ;;  %v1289_v4 = vcombine.high %v1288_v3, %v1288_v3  ;;  %v1296_v47 = vrot.slane %v1288_v3, %v2644_v12 }
 0x2da   : > { %v1386_v5 = vpop.f32.mrb[6].mxu1 }
 0x2db   : > { %1204 = vst.msk [vmem:[%s2650_s25 + $0x1d] sm:$0x1] %vm655_vm3, %v1196_v45  ;;  %v1303_v54 = vrot.slane %v1289_v4, %v2644_v12  ;;  %v1304_v25 = vcombine.high %v1296_v47, %v1296_v47  ;;  %1310 = vst.msk [vmem:[%s2650_s25 + $0x6] sm:$0x1] %vm655_vm3, %v1296_v47  ;;  %v1397_v6 = vrot.slane %v1386_v5, %v2644_v12  ;;  %v1685_v7 = vpop.f32.mrb[7].mxu1 }
 0x2dd   : > { %v1305_v29 = vcombine.high %v1303_v54, %v1303_v54  ;;  %1311 = vst.msk [vmem:[%s2650_s25 + $0xe] sm:$0x1] %vm655_vm3, %v1303_v54  ;;  %1312 = vst.msk [vmem:[%s2650_s25 + $0x16] sm:$0x1] %vm655_vm3, %v1304_v25  ;;  %v1398_v27 = vcombine.high %v1397_v6, %v1397_v6  ;;  %v1405_v36 = vrot.slane %v1397_v6, %v2644_v12 }
 0x2df   : > { %1313 = vst.msk [vmem:[%s2650_s25 + $0x1e] sm:$0x1] %vm655_vm3, %v1305_v29  ;;  %v1412_v8 = vrot.slane %v1398_v27, %v2644_v12  ;;  %v1413_v9 = vcombine.high %v1405_v36, %v1405_v36  ;;  %1419 = vst.msk [vmem:[%s2650_s25 + $0x7] sm:$0x1] %vm655_vm3, %v1405_v36 }
 0x2e1   : > { %v1414_v13 = vcombine.high %v1412_v8, %v1412_v8  ;;  %1420 = vst.msk [vmem:[%s2650_s25 + $0xf] sm:$0x1] %vm655_vm3, %v1412_v8  ;;  %1421 = vst.msk [vmem:[%s2650_s25 + $0x17] sm:$0x1] %vm655_vm3, %v1413_v9 }
 0x2e3   : > { %1422 = vst.msk [vmem:[%s2650_s25 + $0x1f] sm:$0x1] %vm655_vm3, %v1414_v13 }
 0x2e4   : > { %1995 = shalt.err (!%p1992_p7)
}
 0x2e5   : > { %s1996_s5 = scalar_lea.hbm %s2737_s14, 512  ;;  %s2000_s10 = scalar_lea.hbm %s2803_s4, 2048 }
 0x2e6   : > { %p1997_p12 = scmp.ne.s32.totalorder %s2737_s14, %s1996_s5  ;;  %p2001_p5 = scmp.lt.u32.totalorder %s2737_s14, %s2803_s4 }
 0x2e7   : > { %p2002_p9 = scmp.lt.u32.totalorder %s2000_s10, %s1996_s5  ;;  %p2004_p1 = scmp.lt.u32.totalorder %s1996_s5, %s2737_s14 }
 0x2e8   : > { %p1998_p11 = pnand %p1997_p12, %p2293_p4 }
 0x2e9   : > { %p2003_p0 = por %p2002_p9, %p2001_p5 }
 0x2ea   : > { %p1999_p13 = pneg %p1998_p11 }
 0x2eb   : > { %p2005_p2 = por %p2004_p1, %p2003_p0 }
 0x2ed   : > { %p2006_p10 = pnand %p2005_p2, %p1999_p13 }
 0x2ef   : > { %2009 = shalt.err (!%p2006_p10)
}
 0x2f0   : > { %s2101_s3 = smov 128   ;;  %s2102_s25 = smov 256  }
 0x2f1   : > { %s2103_s27 = smov 8  }
 0x2f2   : > { %1732 = dma.vmem_to_hbm [thread:$0]  (%p2293_p4), %s2739_s18, 512, %s2737_s14, %s1424_s2, %s2101_s3, %s2102_s25, %s2103_s27  }
 0x2f3 PF: > { %s2836_s19 = sld [smem:[#allocation15_spill]]  ;;  %p1759_p6 = scmp.ge.s32.totalorder %s2088_s22, 2 }
 0x2f4   : > { %s1453_s29 = sand.u32 1, %s2060_s15  }
 0x2f5   : > { %s1454_s28 = scalar_lea.sflag [#allocation4], %s1453_s29 }
 0x2f9   : > { %p2837_p8 = scmp.ne.s32.totalorder %s2836_s19, 0 }
 0x2fb   : > { %p1749_p3 = pnand %p1759_p6, %p2837_p8 }
 0x2fd   : > { %2055 = dma.done.wait (!%p1749_p3), %s1454_s28, 512  }
 0x2fe   : > { %2057 = vsyncadd (!%p1749_p3), %s1454_s28, 4294966784  ;;  %s22_s22 = sadd.s32 1, %s2088_s22   ;;  %s2838_s23 = sld [smem:[#allocation16_spill]] }
 0x2ff   : > { %p19_p7 = scmp.ge.s32.totalorder %s22_s22, 6   ;;  %s2839_s1 = sld [smem:[#allocation17_spill]] }
 0x300   : > { %s2840_s15 = smov %s2064_s16  ;;  %s2841_s16 = smov %s2068_s17 }
 0x301   : > { %s2842_s17 = smov %s2310_s12  ;;  %s2843_s18 = smov %s2080_s20 }
 0x302   : > { %s2844_s19 = smov %s2084_s21  ;;  %21 = sbr.rel (!%p19_p7) target bundleno = 13 (0xd), region = 93 }
 0x304   : > { %s2845_s20 = smov %s2838_s23 }
 0x305   : > { %s2846_s21 = smov %s2839_s1 }
 0x309   :  { %1459 = vsyncpa [#allocation3], 1 }
 0x30a   :  { %1461 = vsyncpa [#allocation3 + $0x1], 1 }
 0x30b   :  { %1462 = vsyncpa [#allocation6], 1 }
 0x30c   :  { %1463 = vsyncpa [#allocation9], 1 }
 0x30d   :  { %1464 = vsyncpa [#allocation4], 1 }
 0x30e   :  { %1466 = vsyncpa [#allocation4 + $0x1], 1 }

</bundles_post_ra>
